<compile_context>
chip_gen: v7x
topology: tpu7x:2x2x1
jax: 0.10.0
libtpu: 0.0.40
codegen_flags: <defaults>
</compile_context>

<pallas_src>
import math

import jax
import jax.numpy as jnp
import numpy as np
from jax import lax
from jax.experimental import pallas as pl
from jax.experimental.pallas import tpu as pltpu


_BLOCK_BUDGET = 1 << 20           # ~1 MiB target bytes per grid-step block
_FLAT_RESID_BUDGET = 512 << 10    # flat-roll residual block (v5e-friendly)
_FLAT_COPY_BUDGET = 1 << 20


def _mosaic_params(n_grid, block_bytes):
    """Copy-style grids are order-independent -> 'parallel' everywhere (keeps
    the v7x 2-TensorCore split).  VMEM limit scales with the block size."""
    return pltpu.CompilerParams(
        dimension_semantics=("parallel",) * n_grid,
        vmem_limit_bytes=int(min(64 << 20, max(32 << 20, 8 * block_bytes))))


# ---------------------------------------------------------------------------
# One-time pltpu.roll hardware self-checks (direction + availability).
# NOTE: cached per process; a process driving mixed TPU generations should
# clear _PROBES between backends.
# ---------------------------------------------------------------------------
_PROBES = {}


def _roll_convention():
    """+1 if pltpu.roll matches jnp.roll, -1 if it rotates the other way,
    0 if it does not lower on this chip (slice+concat fallback everywhere)."""
    if "conv" in _PROBES:
        return _PROBES["conv"]

    def probe(x_ref, o_ref):
        v = pltpu.roll(x_ref[...], 3, axis=1)
        o_ref[...] = pltpu.roll(v, 2, axis=0)

    conv = 0
    try:
        x = jnp.arange(8 * 128, dtype=jnp.int32).reshape(8, 128)
        out = np.asarray(jax.block_until_ready(
            pl.pallas_call(
                probe,
                out_shape=jax.ShapeDtypeStruct((8, 128), jnp.int32))(x)))
        xn = np.arange(8 * 128, dtype=np.int32).reshape(8, 128)
        if np.array_equal(out, np.roll(np.roll(xn, 3, axis=1), 2, axis=0)):
            conv = 1
        elif np.array_equal(out, np.roll(np.roll(xn, -3, axis=1), -2, axis=0)):
            conv = -1
    except Exception:
        conv = 0
    _PROBES["conv"] = conv
    return conv


def _narrow_sublane_roll_ok():
    """Can pltpu.roll rotate sublanes of a tile whose lane dim is < 128?"""
    if "narrow" in _PROBES:
        return _PROBES["narrow"]
    ok = False
    conv = _roll_convention()
    if conv != 0:
        def probe(x_ref, o_ref):
            o_ref[...] = pltpu.roll(x_ref[...], 3 if conv > 0 else 13, axis=0)

        try:
            xn = np.arange(16 * 16, dtype=np.float32).reshape(16, 16)
            out = np.asarray(jax.block_until_ready(
                pl.pallas_call(
                    probe,
                    out_shape=jax.ShapeDtypeStruct((16, 16), jnp.float32))(
                        jnp.asarray(xn))))
            ok = bool(np.array_equal(out, np.roll(xn, 3, axis=0)))
        except Exception:
            ok = False
    _PROBES["narrow"] = ok
    return ok


def _hw_roll(v, shift, axis, conv):
    """jnp.roll-semantics rotate on the XLU, independent of HW convention."""
    n = v.shape[axis]
    s = shift % n
    if s == 0:
        return v
    if conv < 0:
        s = n - s
    return pltpu.roll(v, s, axis=axis)


# ---------------------------------------------------------------------------
# Explicit-dims roll: major dims via index_map (pure DMA), minor dims in-kernel.
# ---------------------------------------------------------------------------
def _roll_nd(x, shift_by_dim):
    """Roll an ndim>=2 array.  shift_by_dim: {normalized dim: shift in [1,n)}."""
    shape = x.shape
    ndim = x.ndim
    itemsize = x.dtype.itemsize
    n_major = ndim - 2

    major = {d: s for d, s in shift_by_dim.items() if d < n_major and s}
    minor = {d - n_major: s for d, s in shift_by_dim.items()
             if d >= n_major and s}
    minor_items = sorted(minor.items())

    H, W = shape[-2], shape[-1]

    # Trailing-tile size guard: tile the sublane dim only if it is not rolled
    # and the full (H, W) tile alone blows the per-block budget.
    blk_h = H
    if 0 not in minor and H % 8 == 0 and H * W * itemsize > _BLOCK_BUDGET:
        cands = [h for h in range(8, H, 8)
                 if H % h == 0 and h * W * itemsize <= _BLOCK_BUDGET]
        blk_h = max(cands) if cands else 8
    # TODO(synk): when the *rolled* trailing dims alone exceed VMEM (e.g. a
    # 2048x2048 f32 tile on v7x), tile them with the prev-tile/borrow pattern
    # used in _flat_roll instead of a single full-extent block.

    # Fold non-rolled major dims into the block: bigger DMAs, fewer grid steps.
    # With in-kernel minor rolls the fold is capped so the per-slice loop
    # stays a small static unroll.
    fold = set()
    if blk_h == H:
        cap = 16 if minor_items else (1 << 30)
        bb, cnt = H * W * itemsize, 1
        for d in range(n_major - 1, -1, -1):
            if d in major:
                continue
            if bb * shape[d] > _BLOCK_BUDGET or cnt * shape[d] > cap:
                continue
            fold.add(d)
            bb *= shape[d]
            cnt *= shape[d]

    grid_dims = [d for d in range(n_major) if d not in fold]
    grid = tuple(shape[d] for d in grid_dims) + (H // blk_h,)
    block_shape = tuple(shape[d] if d in fold else None
                        for d in range(n_major)) + (blk_h, W)
    folded_shape = tuple(shape[d] for d in sorted(fold))
    block_bytes = blk_h * W * itemsize
    for e in folded_shape:
        block_bytes *= e

    pos = {d: i for i, d in enumerate(grid_dims)}

    def in_map(*g):
        idx = []
        for d in range(n_major):
            if d in fold:
                idx.append(0)
            else:
                gi = g[pos[d]]
                s = major.get(d, 0)
                idx.append((gi + shape[d] - s) % shape[d] if s else gi)
        return tuple(idx) + (g[-1], 0)

    def out_map(*g):
        idx = [0 if d in fold else g[pos[d]] for d in range(n_major)]
        return tuple(idx) + (g[-1], 0)

    # In-kernel minor-dim rolls: XLU rotate when legal, slice+concat fallback.
    conv = _roll_convention() if minor_items else 0
    can_hw = conv != 0 and itemsize == 4
    hw = {}
    for ax, _ in minor_items:
        if ax == 0:   # sublane roll
            hw[ax] = can_hw and blk_h % 8 == 0 and (
                W % 128 == 0 or _narrow_sublane_roll_ok())
        else:         # lane roll
            hw[ax] = can_hw and W % 128 == 0 and blk_h % 8 == 0
    # TODO(synk): bf16/int8 lane rolls via pltpu.bitcast lane-pair packing.

    def roll2d(v):
        for ax, s in minor_items:
            if hw[ax]:
                v = _hw_roll(v, s, ax, conv)
            else:
                n = v.shape[ax]
                hi = (slice(None),) * ax + (slice(n - s, None),)
                lo = (slice(None),) * ax + (slice(0, n - s),)
                v = jnp.concatenate([v[hi], v[lo]], axis=ax)
        return v

    def kernel(x_ref, o_ref):
        if not minor_items:
            o_ref[...] = x_ref[...]            # pure DMA re-addressing
        elif not folded_shape:
            o_ref[...] = roll2d(x_ref[...])
        else:
            for idx in np.ndindex(*folded_shape):   # small static unroll
                o_ref[idx] = roll2d(x_ref[idx])

    return pl.pallas_call(
        kernel,
        out_shape=jax.ShapeDtypeStruct(shape, x.dtype),
        grid=grid,
        in_specs=[pl.BlockSpec(block_shape, in_map)],
        out_specs=pl.BlockSpec(block_shape, out_map),
        compiler_params=_mosaic_params(len(grid), block_bytes),
        cost_estimate=pl.CostEstimate(
            flops=0, transcendentals=0, bytes_accessed=2 * x.size * itemsize),
    )(x)


# ---------------------------------------------------------------------------
# Flattened roll (dims[0] is None): widest lane-dense (R, C) view.
# ---------------------------------------------------------------------------
def _flat_roll(x_flat, numel, shift):
    s = int(shift) % numel
    if s == 0:
        return x_flat
    itemsize = x_flat.dtype.itemsize

    view = None
    if itemsize == 4:
        for C in (2048, 1024, 512, 256, 128):
            if numel % C == 0 and (numel // C) % 8 == 0:
                view = (numel // C, C)
                break
    if view is None:
        # TODO(synk): pack 16/8-bit dtypes to u32 lanes with pltpu.bitcast;
        # tiny / oddly-sized arrays use the in-kernel slice+concat fallback.
        return _roll_nd(x_flat.reshape(1, numel), {1: s})

    R, C = view
    y = x_flat.reshape(R, C)
    r, c = divmod(s, C)                       # whole rows + residual lanes

    def pick_t(max_bytes, must_divide):
        cands = [t for t in range(8, must_divide + 1, 8)
                 if must_divide % t == 0 and t * C * itemsize <= max_bytes]
        return max(cands) if cands else None

    # Pure-copy path: shift is a whole number of row tiles -> DMA only.
    if c == 0:
        T = pick_t(_FLAT_COPY_BUDGET, math.gcd(R, r))
        if T is not None:
            nb, B = R // T, r // T

            def copy_kernel(cur_ref, o_ref):
                o_ref[...] = cur_ref[...]

            out = pl.pallas_call(
                copy_kernel,
                out_shape=jax.ShapeDtypeStruct((R, C), y.dtype),
                grid=(nb,),
                in_specs=[pl.BlockSpec((T, C),
                                       lambda i: ((i + nb - B) % nb, 0))],
                out_specs=pl.BlockSpec((T, C), lambda i: (i, 0)),
                compiler_params=_mosaic_params(1, T * C * itemsize),
                cost_estimate=pl.CostEstimate(
                    flops=0, transcendentals=0,
                    bytes_accessed=2 * numel * itemsize),
            )(y)
            return out.reshape(-1)

    # Residual path: whole row-tiles via index_map; residual rows come from a
    # thin P-row "prev tail" block; residual lanes via one XLU rotate + select.
    T = pick_t(_FLAT_RESID_BUDGET, R) or 8
    nb = R // T
    B, t = divmod(r, T)
    P = min(p for p in range(8, T + 1, 8) if T % p == 0 and p >= t + 1)
    k = T // P
    a0 = P - t
    conv = _roll_convention()

    def rot_lane(v, cc):
        if cc == 0:
            return v
        if conv != 0:
            return _hw_roll(v, cc, 1, conv)
        n = v.shape[1]
        return jnp.concatenate([v[:, n - cc:], v[:, :n - cc]], axis=1)

    def kernel(cur_ref, prev_ref, o_ref):
        # Rows of [prev_tail; cur] are the contiguous global input rows
        # [base - P, base + T), base = ((i - B) mod nb) * T, so the static
        # slices below are exactly A[p]  = in[base + p - t]      (lanes >= c)
        #                      and A'[p] = in[base + p - t - 1]  (lanes <  c).
        e = jnp.concatenate([prev_ref[...], cur_ref[...]], axis=0)  # (P+T, C)
        if c == 0:
            o_ref[...] = e[a0:a0 + T]
            return
        u = rot_lane(e[a0:a0 + T], c)
        u1 = rot_lane(e[a0 - 1:a0 - 1 + T], c)
        lane = lax.broadcasted_iota(jnp.int32, (T, C), 1)
        o_ref[...] = jnp.where(lane >= c, u, u1)

    out = pl.pallas_call(
        kernel,
        out_shape=jax.ShapeDtypeStruct((R, C), y.dtype),
        grid=(nb,),
        in_specs=[
            pl.BlockSpec((T, C), lambda i: ((i + nb - B) % nb, 0)),     # cur
            pl.BlockSpec((P, C),                                        # prev
                         lambda i: (((i + 2 * nb - B - 1) % nb) * k + (k - 1),
                                    0)),
        ],
        out_specs=pl.BlockSpec((T, C), lambda i: (i, 0)),
        compiler_params=_mosaic_params(1, (T + P) * C * itemsize),
        cost_estimate=pl.CostEstimate(
            flops=0, transcendentals=0,
            bytes_accessed=(2 * numel + nb * P * C) * itemsize),
    )(y, y)
    return out.reshape(-1)


# ---------------------------------------------------------------------------
# Public wrapper: JAX/Pallas equivalent of SliceCopy.forward.
# ---------------------------------------------------------------------------
def slice_copy(x, val_shape, shifts, dims):
    val_shape = tuple(int(v) for v in val_shape)

    if dims[0] is None:
        numel = int(np.prod(val_shape))
        return _flat_roll(x.reshape(-1), numel,
                          int(shifts[0])).reshape(val_shape)

    ndim = x.ndim
    acc = {}
    for s, d in zip(shifts, dims):
        d = int(d) % ndim                      # normalize negative dims
        n = x.shape[d]
        acc[d] = (acc.get(d, 0) + int(s)) % n  # sequential rolls add mod n
    acc = {d: s for d, s in acc.items() if s}

    if not acc:
        return x                               # all shifts were 0 -> identity
    if ndim == 1:
        return _flat_roll(x, x.shape[0], acc[0]).reshape(val_shape)
    return _roll_nd(x, acc)


if __name__ == "__main__":
    key = jax.random.PRNGKey(0)
    k1, k2 = jax.random.split(key)

    # batch=2, channels=4, spatial=16, width=128 (lane-dense on TPU).
    val_shape = (2, 4, 16, 128)
    x = jax.random.normal(k1, val_shape, dtype=jnp.float32)

    # Case 1: roll a major dim (pure DMA re-addressing, non-rolled batch dim
    # folded into the block) plus both trailing dims (XLU rotates).  Includes
    # a negative shift and a negative dim.
    shifts, dims = [3, -5, 37], [1, -2, 3]
    out1 = jax.block_until_ready(slice_copy(x, val_shape, shifts, dims))
    ref1 = jnp.roll(x, shift=tuple(shifts), axis=tuple(dims))
    assert out1.shape == x.shape and out1.dtype == x.dtype
    np.testing.assert_array_equal(np.asarray(out1), np.asarray(ref1))

    # Case 2: dims[0] is None -> flattened roll; wide lane-dense (R, C) view
    # with a thin prev-tail block for the borrow rows.
    out2 = jax.block_until_ready(slice_copy(x, val_shape, [7777], [None]))
    ref2 = jnp.roll(x.reshape(-1), 7777).reshape(val_shape)
    assert out2.shape == x.shape and out2.dtype == x.dtype
    np.testing.assert_array_equal(np.asarray(out2), np.asarray(ref2))

    # Case 3: trailing width 16 (< 128): narrow-lane path, whole array folded
    # into a single block; sublane roll on the XLU if the probe allows it,
    # lane roll via the slice+concat fallback.
    val_shape3 = (2, 4, 16, 16)
    x3 = jax.random.normal(k2, val_shape3, dtype=jnp.float32)
    out3 = jax.block_until_ready(slice_copy(x3, val_shape3, [3, 5], [2, 3]))
    ref3 = jnp.roll(x3, shift=(3, 5), axis=(2, 3))
    np.testing.assert_array_equal(np.asarray(out3), np.asarray(ref3))

    # Case 4: major-dim-only roll -> pure copy kernel, channel dim folded.
    out4 = jax.block_until_ready(slice_copy(x, val_shape, [1], [0]))
    ref4 = jnp.roll(x, shift=1, axis=0)
    np.testing.assert_array_equal(np.asarray(out4), np.asarray(ref4))

    print("KERNEL_OK")
</pallas_src>

<mosaic_0001>
module attributes {stable_mosaic.version = 11 : i64} {
  func.func @probe(%arg0: memref<8x128xi32, #tpu.memory_space<vmem>>, %arg1: memref<8x128xi32, #tpu.memory_space<vmem>>) attributes {dimension_semantics = [], scalar_prefetch = 0 : i64, scratch_operands = 0 : i64, tpu.core_type = #tpu.core_type<tc>} {
    %c0 = arith.constant 0 : index
    %c0_0 = arith.constant 0 : index
    %0 = vector.load %arg0[%c0, %c0_0] : memref<8x128xi32, #tpu.memory_space<vmem>>, vector<8x128xi32>
    %c3_i32 = arith.constant 3 : i32
    %1 = tpu.dynamic_rotate %0 by %c3_i32 dim 1 : vector<8x128xi32>, i32 -> vector<8x128xi32>
    %c2_i32 = arith.constant 2 : i32
    %2 = tpu.dynamic_rotate %1 by %c2_i32 dim 0 : vector<8x128xi32>, i32 -> vector<8x128xi32>
    %c0_1 = arith.constant 0 : index
    %c0_2 = arith.constant 0 : index
    %3 = vector.load %arg1[%c0_1, %c0_2] : memref<8x128xi32, #tpu.memory_space<vmem>>, vector<8x128xi32>
    tpu.vector_store %arg1[%c0_1, %c0_2], %2 {strides = array<i32>} : memref<8x128xi32, #tpu.memory_space<vmem>>, vector<8x128xi32>,
    return
  }
}

module attributes {stable_mosaic.version = 11 : i64} {
  func.func @kernel(%arg0: i32, %arg1: i32, %arg2: memref<2x1x16x128xf32, #tpu.memory_space<vmem>>, %arg3: memref<2x1x16x128xf32, #tpu.memory_space<vmem>>) attributes {dimension_semantics = [#tpu.dimension_semantics<parallel>, #tpu.dimension_semantics<parallel>], iteration_bounds = array<i64: 4, 1>, scalar_prefetch = 0 : i64, scratch_operands = 0 : i64, tpu.core_type = #tpu.core_type<tc>, window_params = [{transform_indices = @transform_0, window_bounds = array<i64: 2, 1, 16, 128>}, {transform_indices = @transform_1, window_bounds = array<i64: 2, 1, 16, 128>}]} {
    %c0 = arith.constant 0 : index
    %c0_0 = arith.constant 0 : index
    %c0_1 = arith.constant 0 : index
    %c0_2 = arith.constant 0 : index
    %0 = vector.load %arg2[%c0, %c0_0, %c0_1, %c0_2] : memref<2x1x16x128xf32, #tpu.memory_space<vmem>>, vector<1x1x16x128xf32>
    %1 = vector.shape_cast %0 : vector<1x1x16x128xf32> to vector<16x128xf32>
    %2 = vector.extract_strided_slice %1 {offsets = [5, 0], sizes = [11, 128], strides = [1, 1]} : vector<16x128xf32> to vector<11x128xf32>
    %3 = vector.extract_strided_slice %1 {offsets = [0, 0], sizes = [5, 128], strides = [1, 1]} : vector<16x128xf32> to vector<5x128xf32>
    %4 = tpu.concatenate %2, %3 in 0 : vector<11x128xf32>, vector<5x128xf32> -> vector<16x128xf32>
    %5 = vector.extract_strided_slice %4 {offsets = [0, 91], sizes = [16, 37], strides = [1, 1]} : vector<16x128xf32> to vector<16x37xf32>
    %6 = vector.extract_strided_slice %4 {offsets = [0, 0], sizes = [16, 91], strides = [1, 1]} : vector<16x128xf32> to vector<16x91xf32>
    %7 = tpu.concatenate %5, %6 in 1 : vector<16x37xf32>, vector<16x91xf32> -> vector<16x128xf32>
    %c0_3 = arith.constant 0 : index
    %c0_4 = arith.constant 0 : index
    %c0_5 = arith.constant 0 : index
    %c0_6 = arith.constant 0 : index
    %8 = vector.load %arg3[%c0_3, %c0_4, %c0_5, %c0_6] : memref<2x1x16x128xf32, #tpu.memory_space<vmem>>, vector<1x1x16x128xf32>
    %9 = vector.shape_cast %8 : vector<1x1x16x128xf32> to vector<16x128xf32>
    %10 = vector.shape_cast %7 : vector<16x128xf32> to vector<1x1x16x128xf32>
    tpu.vector_store %arg3[%c0_3, %c0_4, %c0_5, %c0_6], %10 {strides = array<i32>} : memref<2x1x16x128xf32, #tpu.memory_space<vmem>>, vector<1x1x16x128xf32>,
    %c1 = arith.constant 1 : index
    %c0_7 = arith.constant 0 : index
    %c0_8 = arith.constant 0 : index
    %c0_9 = arith.constant 0 : index
    %11 = vector.load %arg2[%c1, %c0_7, %c0_8, %c0_9] : memref<2x1x16x128xf32, #tpu.memory_space<vmem>>, vector<1x1x16x128xf32>
    %12 = vector.shape_cast %11 : vector<1x1x16x128xf32> to vector<16x128xf32>
    %13 = vector.extract_strided_slice %12 {offsets = [5, 0], sizes = [11, 128], strides = [1, 1]} : vector<16x128xf32> to vector<11x128xf32>
    %14 = vector.extract_strided_slice %12 {offsets = [0, 0], sizes = [5, 128], strides = [1, 1]} : vector<16x128xf32> to vector<5x128xf32>
    %15 = tpu.concatenate %13, %14 in 0 : vector<11x128xf32>, vector<5x128xf32> -> vector<16x128xf32>
    %16 = vector.extract_strided_slice %15 {offsets = [0, 91], sizes = [16, 37], strides = [1, 1]} : vector<16x128xf32> to vector<16x37xf32>
    %17 = vector.extract_strided_slice %15 {offsets = [0, 0], sizes = [16, 91], strides = [1, 1]} : vector<16x128xf32> to vector<16x91xf32>
    %18 = tpu.concatenate %16, %17 in 1 : vector<16x37xf32>, vector<16x91xf32> -> vector<16x128xf32>
    %c1_10 = arith.constant 1 : index
    %c0_11 = arith.constant 0 : index
    %c0_12 = arith.constant 0 : index
    %c0_13 = arith.constant 0 : index
    %19 = vector.load %arg3[%c1_10, %c0_11, %c0_12, %c0_13] : memref<2x1x16x128xf32, #tpu.memory_space<vmem>>, vector<1x1x16x128xf32>
    %20 = vector.shape_cast %19 : vector<1x1x16x128xf32> to vector<16x128xf32>
    %21 = vector.shape_cast %18 : vector<16x128xf32> to vector<1x1x16x128xf32>
    tpu.vector_store %arg3[%c1_10, %c0_11, %c0_12, %c0_13], %21 {strides = array<i32>} : memref<2x1x16x128xf32, #tpu.memory_space<vmem>>, vector<1x1x16x128xf32>,
    return
  }
  func.func @transform_0(%arg0: i32, %arg1: i32) -> (i32, i32, i32, i32) {
    %c4_i32 = arith.constant 4 : i32
    %0 = arith.addi %arg0, %c4_i32 : i32
    %c3_i32 = arith.constant 3 : i32
    %1 = arith.subi %0, %c3_i32 : i32
    %c4_i32_0 = arith.constant 4 : i32
    %c0_i32 = arith.constant 0 : i32
    %2 = arith.cmpi eq, %c4_i32_0, %c0_i32 : i32
    %c1_i32 = arith.constant 1 : i32
    %3 = arith.select %2, %c1_i32, %c4_i32_0 : i32
    %4 = arith.remsi %1, %3 : i32
    %c0_i32_1 = arith.constant 0 : i32
    %5 = arith.cmpi ne, %4, %c0_i32_1 : i32
    %c0_i32_2 = arith.constant 0 : i32
    %6 = arith.cmpi slt, %4, %c0_i32_2 : i32
    %c0_i32_3 = arith.constant 0 : i32
    %7 = arith.cmpi slt, %3, %c0_i32_3 : i32
    %8 = arith.xori %6, %7 : i1
    %9 = arith.andi %8, %5 : i1
    %10 = arith.addi %4, %3 : i32
    %11 = arith.select %9, %10, %4 : i32
    %c0_i32_4 = arith.constant 0 : i32
    %c0_i32_5 = arith.constant 0 : i32
    %c0_i32_6 = arith.constant 0 : i32
    return %c0_i32_4, %11, %arg1, %c0_i32_5 : i32, i32, i32, i32
  }
  func.func @transform_1(%arg0: i32, %arg1: i32) -> (i32, i32, i32, i32) {
    %c0_i32 = arith.constant 0 : i32
    %c0_i32_0 = arith.constant 0 : i32
    %c0_i32_1 = arith.constant 0 : i32
    return %c0_i32, %arg0, %arg1, %c0_i32_0 : i32, i32, i32, i32
  }
}

</mosaic_0001>

<bundles_post_ra>
// kernel: tpu_custom_call.1
= control target key start
LH: loop header
LB: loop body
LE: loop exit
PB: predicated region body
PF: predicated region fallthrough
CT: control target
= control target key end

     0   :  { %6 = vsyncpa [#allocation3], 0  ;;  %s129_s0 = inlined_call_operand.hbm [shape: s32[8,128], index: 0, kind: input, shape index: {}]   ;;  %s130_s1 = inlined_call_operand.hbm [shape: s32[8,128], index: 1, kind: output, shape index: {}]  }
   0x1   :  { %7 = vsyncpa [#allocation4], 0  ;;  %s92_s6 = smov [#allocation2]   ;;  %s44_s10 = scalar_lea.hbm %s129_s0, 128 }
   0x2   :  { %s14_s7 = sshll.u32 %s92_s6, 4  ;;  %p45_p0 = scmp.ne.s32.totalorder %s129_s0, %s44_s10  ;;  %s15_s7 = int_to_ptr.vmem [resolvable:$true] %s14_s7 }
   0x3   :  { %p48_p1 = scmp.lt.u32.totalorder %s44_s10, %s129_s0 }
   0x5   :  { %p50_p2 = pnand %p48_p1, %p45_p0 }
   0x7   :  { %53 = shalt.err (!%p50_p2)
}
   0x8   :  { %s54_s15 = scalar_lea.vmem %s15_s7, 128  ;;  %p59_p4 = scmp.lt.s32.totalorder %s15_s7, %s15_s7 }
   0x9   :  { %p55_p3 = scmp.ne.s32.totalorder %s15_s7, %s54_s15  ;;  %p60_p5 = scmp.lt.s32.totalorder %s54_s15, %s54_s15 }
   0xb   :  { %p61_p6 = por %p60_p5, %p59_p4 }
   0xd   :  { %p62_p7 = pnand %p61_p6, %p55_p3 }
   0xf   :  { %65 = shalt.err (!%p62_p7)
}
  0x10   :  { %17 = dma.hbm_to_vmem [thread:$0]  %s129_s0, 128, %s15_s7, [#allocation3]  }
  0x11   :  { %88 = dma.done.wait [#allocation3], 128  }
  0x12   :  { %89 = vsyncadd [#allocation3], 4294967168  ;;  %v21_v0 = vld [vmem:[#allocation2] sm:$0xff]  ;;  %s93_s18 = smov 3   ;;  %s94_s19 = smov [#allocation5]  }
  0x13   :  { %22 = vrot.lane.b32.xlu0 %v21_v0, %s93_s18  ;;  %s32_s20 = sshll.u32 %s94_s19, 4  ;;  %s33_s20 = int_to_ptr.vmem [resolvable:$true] %s32_s20 }
  0x14   :  { %s66_s21 = scalar_lea.vmem %s33_s20, 128  ;;  %p71_p9 = scmp.lt.s32.totalorder %s33_s20, %s33_s20 }
  0x15   :  { %p67_p8 = scmp.ne.s32.totalorder %s33_s20, %s66_s21  ;;  %p72_p10 = scmp.lt.s32.totalorder %s66_s21, %s66_s21 }
  0x17   :  { %p73_p11 = por %p72_p10, %p71_p9 }
  0x19   :  { %p74_p12 = pnand %p73_p11, %p67_p8 }
  0x85   :  { %v23_v1 = vpop.permute.xlu0 %22 }
  0x86   :  { %v24_v2 = vrot.slane %v23_v1, 6 }
  0x88   :  { %25 = vst [vmem:[#allocation5] sm:$0xff] %v24_v2 }
  0x89   :  { %77 = shalt.err (!%p74_p12)
}
  0x8a   :  { %s78_s23 = scalar_lea.hbm %s130_s1, 128 }
  0x8b   :  { %p79_p13 = scmp.ne.s32.totalorder %s130_s1, %s78_s23  ;;  %p82_p0 = scmp.lt.u32.totalorder %s78_s23, %s130_s1 }
  0x8d   :  { %p84_p1 = pnand %p82_p0, %p79_p13 }
  0x8f   :  { %87 = shalt.err (!%p84_p1)
}
  0x90   :  { %35 = dma.vmem_to_hbm [thread:$0]  %s33_s20, 128, %s130_s1, [#allocation4]  }
  0x91   :  { %90 = dma.done.wait [#allocation4], 128  }
  0x92   :  { %91 = vsyncadd [#allocation4], 4294967168 }
  0x93   :  { %39 = vsyncpa [#allocation3], 1 }
  0x94   :  { %40 = vsyncpa [#allocation4], 1 }

// kernel: tpu_custom_call.1
= control target key start
LH: loop header
LB: loop body
LE: loop exit
PB: predicated region body
PF: predicated region fallthrough
CT: control target
= control target key end

     0   :  { %6 = vsyncpa [#allocation3], 0  ;;  %s818_s0 = inlined_call_operand.hbm [shape: f32[2,4,16,128], index: 0, kind: input, shape index: {}]   ;;  %s819_s1 = inlined_call_operand.hbm [shape: f32[2,4,16,128], index: 1, kind: output, shape index: {}]  }
   0x1   :  { %8 = vsyncpa [#allocation3 + $0x1], 0 }
   0x2   :  { %9 = vsyncpa [#allocation4], 0 }
   0x3   :  { %11 = vsyncpa [#allocation4 + $0x1], 0  ;;  %s649_s6 = smov 0   ;;  %s651_s7 = smov 0  }
   0x4   :  { %s653_s8 = smov 0   ;;  %s655_s9 = smov 0  }
   0x5   :  { %s657_s10 = smov 0   ;;  %s659_s11 = smov 0  }
   0x6   :  { %s661_s12 = smov 0   ;;  %s663_s13 = smov 0  }
   0x7   :  { %s665_s14 = smov 0  }
   0x8 LB: > { %s405_s15 = sadd.s32 4294967295, %s623_s14   ;;  %s406_s16 = sadd.s32 4294967294, %s623_s14   ;;  %s623_s14 = sphi %s665_s14, %s17_s14   ;;  %s619_s13 = sphi %s663_s13, %s831_s13   ;;  %s615_s12 = sphi %s661_s12, %s830_s12   ;;  %s611_s11 = sphi %s659_s11, %s829_s11   ;;  %s607_s10 = sphi %s657_s10, %s828_s10   ;;  %s603_s9 = sphi %s655_s9, %s827_s9   ;;  %s599_s8 = sphi %s653_s8, %s826_s8   ;;  %s595_s7 = sphi %s651_s7, %s825_s7   ;;  %s591_s6 = sphi %s649_s6, %s824_s6  }
   0x9   : > { %s29_s17 = sadd.s32 1, %s619_s13  ;;  %s64_s18 = sadd.s32 1, %s611_s11 }
   0xa   : > { %p31_p0 = scmp.ge.s32.totalorder %s29_s17, 4  ;;  %s35_s19 = ssub.s32 0, %s29_s17 }
   0xb   : > { %p71_p1 = scmp.ne.s32.totalorder %s611_s11, %s607_s10  ;;  %s407_s21 = smin.u32 %s35_s19, %s29_s17 }
   0xc   : > { %s698_s20 = scalar_select %p31_p0, 0, %s29_s17  }
   0xd   : > { %p72_p2 = scmp.eq.s32.totalorder %s623_s14, 0  ;;  %s37_s22 = sand.u32 3, %s407_s21  }
   0xe   : > { %s46_s23 = sadd.s32 1, %s698_s20  ;;  %p409_p4 = scmp.lt.s32.totalorder %s37_s22, 0 }
   0xf   : > { %s48_s24 = ssub.s32 0, %s46_s23  ;;  %p702_p3 = por %p72_p2, %p71_p1 }
  0x10   : > { %s44_s26 = sadd.s32 4, %s37_s22  ;;  %s410_s27 = smin.u32 %s48_s24, %s46_s23 }
  0x11   : > { %p77_p5 = scmp.ne.s32.totalorder %s607_s10, %s603_s9  ;;  %s833_s26 = smov (!%p409_p4, %s44_s26), %s37_s22 }
  0x12   : > { %s50_s28 = sand.u32 3, %s410_s27   ;;  %p78_p6 = scmp.eq.s32.totalorder %s405_s15, 0 }
  0x13   : > { %s87_s29 = ssub.s32 %s619_s13, %s698_s20  ;;  %p412_p9 = scmp.lt.s32.totalorder %s50_s28, 0 }
  0x14   : > { %p711_p7 = por %p78_p6, %p77_p5  ;;  %p90_p8 = scmp.eq.s32.totalorder %s87_s29, 0 }
  0x15   : > { %s57_s2 = sadd.s32 4, %s50_s28  ;;  %s92_s3 = sadd.s32 1, %s599_s8 }
  0x16   : > { %p102_p10 = scmp.ne.s32.totalorder %s599_s8, %s595_s7  ;;  %s835_s2 = smov (!%p412_p9, %s57_s2), %s50_s28 }
  0x17   : > { %s719_s4 = scalar_select %p90_p8, %s599_s8, %s92_s3  }
  0x18   : > { %s59_s5 = ssub.s32 %s833_s26, %s835_s2  ;;  %p103_p11 = scmp.eq.s32.totalorder %s405_s15, 3 }
  0x19   : > { %p62_p12 = scmp.eq.s32.totalorder %s59_s5, 0  ;;  %p108_p13 = scmp.ne.s32.totalorder %s595_s7, %s591_s6 }
  0x1a   : > { %p725_p0 = por %p103_p11, %p102_p10  ;;  %p109_p1 = scmp.eq.s32.totalorder %s406_s16, 3 }
  0x1b   : > { %s734_s17 = scalar_select %p62_p12, %s611_s11, %s64_s18  }
  0x1c   : > { %p736_p2 = por %p109_p1, %p108_p13  ;;  %p414_p4 = scmp.ge.s32.totalorder %s623_s14, 4 }
  0x1e   : > { %125 = sbr.rel (%p414_p4) target bundleno = 50 (0x32), region = 16 }
  0x25   : > { %s129_s15 = sand.u32 1, %s611_s11   ;;  %s435_s21 = sshll.u32 %s833_s26, 8 }
  0x26   : > { %s415_s16 = sshll.u32 %s129_s15, 5  ;;  %s154_s23 = scalar_lea.hbm %s818_s0, %s435_s21 }
  0x27   : > { %s437_s24 = scalar_select %p702_p3, [#allocation0], [#allocation10] }
  0x28   : > { %s133_s27 = scalar_lea.vmem [#allocation2], %s415_s16  ;;  %s625_s2 = smov 1024  }
  0x29   : > { %s167_s28 = sshll.u32 %s133_s27, 4  ;;  %s159_s29 = sld [smem:[%s437_s24]]   ;;  %s168_s28 = int_to_ptr.vmem [resolvable:$true] %s167_s28 }
  0x2a   : > { %438 = sst [smem:[#allocation7]] (%p702_p3), %s625_s2  ;;  %s626_s3 = smov 256  }
  0x2b   : > { %439 = sst [smem:[#allocation7 + $0x1]] (%p702_p3), %s626_s3  ;;  %s627_s26 = smov 2  }
  0x2c   : > { %440 = sst [smem:[#allocation7 + $0x2]] (%p702_p3), %s627_s26  ;;  %s628_s5 = smov 128  }
  0x2d   : > { %441 = sst [smem:[#allocation7 + $0x3]] (%p702_p3), %s628_s5  ;;  %s629_s16 = smov 8  }
  0x2e   : > { %442 = sst [smem:[#allocation7 + $0x4]] (%p702_p3), %s628_s5  ;;  %s130_s18 = scalar_lea.sflag [#allocation3], %s129_s15 }
  0x2f   : > { %s421_s21 = sshll.u32 %s159_s29, 26  ;;  %443 = sst [smem:[#allocation7 + $0x5]] (%p702_p3), %s629_s16 }
  0x30   : > { %s422_s22 = sadd.s32 134217728, %s421_s21  ;;  %s630_s24 = smov [#allocation6]  }
  0x31   : > { %444 = dma.general (%p702_p3), %s154_s23, 512, %s168_s28, %s130_s18, %s630_s24, [#allocation7], %s422_s22, 0  }
  0x32 PF: > { %p423_p5 = scmp.ge.s32.totalorder %s623_s14, 1  ;;  %p188_p6 = scmp.lt.s32.totalorder %s623_s14, 5 }
  0x34   : > { %p189_p8 = pnand %p423_p5, %p188_p6 }
  0x35   : > { %s194_s27 = sand.u32 (!%p189_p8), 1, %s607_s10  }
  0x36   : > { %192 = sbr.rel (%p189_p8) target bundleno = 196 (0xc4), region = 24  ;;  %s424_s2 = sshll.u32 (!%p189_p8), %s194_s27, 5 }
  0x37   : > { %s195_s29 = scalar_lea.sflag (!%p189_p8), [#allocation3], %s194_s27  ;;  %s198_s3 = scalar_lea.vmem (!%p189_p8), [#allocation2], %s424_s2 }
  0x3d   : > { %582 = dma.done.wait (%p711_p7), %s195_s29, 512  }
  0x3e   : > { %584 = vsyncadd (%p711_p7), %s195_s29, 4294966784  ;;  %s214_s25 = sand.u32 1, %s595_s7   ;;  %vm236_vm0 = vcmask 1042432   ;;  %v426_v0 = vld [vmem:[%s198_s3 + $0x10] sm:$0xff]  ;;  %v427_v1 = vld [vmem:[%s198_s3 + $0x18] sm:$0xff]  ;;  %s631_s15 = smov 37  }
  0x3f   : > { %v232_v2 = vld [vmem:[%s198_s3] sm:$0xff]  ;;  %v257_v3 = vrot.slane %v426_v0, 5  ;;  %v258_v4 = vrot.slane %v427_v1, 5  ;;  %v233_v5 = vld [vmem:[%s198_s3 + $0x8] sm:$0xff]  ;;  %s425_s30 = sshll.u32 %s214_s25, 5  ;;  %s274_s28 = scalar_lea.sflag [#allocation4], %s214_s25 }
  0x40   : > { %v237_v6 = vrot.slane %v232_v2, 5  ;;  %v238_v7 = vrot.slane %v233_v5, 5  ;;  %s216_s23 = scalar_lea.vmem [#allocation5], %s425_s30 }
  0x41   : > { %v259_v8 = vsel %vm236_vm0, %v257_v3, %v258_v4  ;;  %v262_v10 = vsel %vm236_vm0, %v258_v4, %v257_v3 }
  0x42   : > { %264 = vrot.lane.b32.xlu1 %v259_v8, %s631_s15  ;;  %v239_v9 = vsel %vm236_vm0, %v237_v6, %v238_v7  ;;  %v242_v11 = vsel %vm236_vm0, %v238_v7, %v237_v6 }
  0x43   : > { %244 = vrot.lane.b32.xlu0 %v239_v9, %s631_s15 }
  0x46   : > { %266 = vrot.lane.b32.xlu1 %v262_v10, %s631_s15 }
  0x47   : > { %246 = vrot.lane.b32.xlu0 %v242_v11, %s631_s15 }
  0xb4   : > { %v265_v12 = vpop.permute.xlu1 %264 }
  0xb5   : > { %428 = vst [vmem:[%s216_s23 + $0x10] sm:$0xff] %v265_v12  ;;  %v245_v13 = vpop.permute.xlu0 %244 }
  0xb6   : > { %250 = vst [vmem:[%s216_s23] sm:$0xff] %v245_v13 }
  0xb8   : > { %v267_v14 = vpop.permute.xlu1 %266 }
  0xb9   : > { %429 = vst [vmem:[%s216_s23 + $0x18] sm:$0xff] %v267_v14  ;;  %v247_v15 = vpop.permute.xlu0 %246 }
  0xba   : > { %251 = vst [vmem:[%s216_s23 + $0x8] sm:$0xff] %v247_v15 }
  0xbb   : > { %s436_s26 = sshll.u32 %s615_s12, 8  ;;  %s305_s5 = sshll.u32 %s216_s23, 4  ;;  %s306_s5 = int_to_ptr.vmem [resolvable:$true] %s305_s5 }
  0xbc   : > { %s288_s22 = scalar_lea.hbm %s819_s1, %s436_s26  ;;  %s632_s18 = smov 256  }
  0xbd   : > { %446 = sst [smem:[#allocation9]] (%p725_p0), %s632_s18  ;;  %s633_s24 = smov 1024  }
  0xbe   : > { %447 = sst [smem:[#allocation9 + $0x1]] (%p725_p0), %s633_s24  ;;  %s634_s27 = smov 2  }
  0xbf   : > { %448 = sst [smem:[#allocation9 + $0x2]] (%p725_p0), %s634_s27  ;;  %s635_s2 = smov 128  }
  0xc0   : > { %449 = sst [smem:[#allocation9 + $0x3]] (%p725_p0), %s635_s2  ;;  %s636_s12 = smov 8  }
  0xc1   : > { %450 = sst [smem:[#allocation9 + $0x4]] (%p725_p0), %s635_s2  ;;  %s637_s29 = smov [#allocation8]  }
  0xc2   : > { %451 = sst [smem:[#allocation9 + $0x5]] (%p725_p0), %s636_s12  ;;  %s638_s3 = smov 0  }
  0xc3   : > { %452 = dma.general (%p725_p0), %s306_s5, 512, %s288_s22, %s274_s28, %s637_s29, [#allocation9], %s638_s3, 0  }
  0xc4 PF: > { %p458_p3 = scmp.ge.s32.totalorder %s623_s14, 2  ;;  %s333_s25 = sand.u32 1, %s591_s6  }
  0xc5   : > { %s334_s15 = scalar_lea.sflag [#allocation4], %s333_s25 }
  0xc6   : > { %p455_p7 = pnand %p458_p3, %p736_p2 }
  0xc8   : > { %586 = dma.done.wait (!%p455_p7), %s334_s15, 512  }
  0xc9   : > { %588 = vsyncadd (!%p455_p7), %s334_s15, 4294966784  ;;  %s17_s14 = sadd.s32 1, %s623_s14   ;;  %s824_s6 = smov %s595_s7 }
  0xca   : > { %p14_p9 = scmp.ge.s32.totalorder %s17_s14, 6   ;;  %s825_s7 = smov %s599_s8 }
  0xcb   : > { %s826_s8 = smov %s719_s4  ;;  %s827_s9 = smov %s607_s10 }
  0xcc   : > { %s828_s10 = smov %s611_s11  ;;  %s829_s11 = smov %s734_s17 }
  0xcd   : > { %s830_s12 = smov %s619_s13  ;;  %s831_s13 = smov %s698_s20 }
  0xce   :  { %16 = sbr.rel (!%p14_p9) target bundleno = 8 (0x8), region = 81 }
  0xd5   :  { %339 = vsyncpa [#allocation3], 1 }
  0xd6   :  { %341 = vsyncpa [#allocation3 + $0x1], 1 }
  0xd7   :  { %342 = vsyncpa [#allocation4], 1 }
  0xd8   :  { %344 = vsyncpa [#allocation4 + $0x1], 1 }

</bundles_post_ra>
